<compile_context>
chip_gen: v7x
topology: tpu7x:2x2x1
jax: 0.10.0
libtpu: 0.0.40
codegen_flags: <defaults>
</compile_context>

<pallas_src>
import functools

import jax
import jax.numpy as jnp
from jax.experimental import pallas as pl
from jax.experimental.pallas import tpu as pltpu

ALPHA = 0.25
GAMMA = 2.0                 # statically 2 -> squared directly in-kernel
LANES = 128
ACC_SUBLANES = 8
TARGET_BLOCK_ROWS = 4096    # 4096x128 f32 = 2 MiB logits block per buffer
VMEM_LIMIT_BYTES = 48 * 1024 * 1024
PAD_LOGIT = 40.0            # focal loss of (logit=+40, label=1) underflows to 0.0 in f32


def _round_up(x, m):
    return ((x + m - 1) // m) * m


def _num_tensorcores():
    """Best-effort TensorCores-per-chip: 2 on megacore (v4/v5p/v7x), else 1."""
    try:
        kind = jax.devices()[0].device_kind.lower()
    except Exception:
        return 1
    if ("v7" in kind) or ("v4" in kind) or ("v5p" in kind) or ("v5 p" in kind):
        return 2
    return 1
    # TODO(synk): profile-verify the "parallel" axis actually core-shards on v7x;
    # if not, switch that axis to pltpu.CORE_PARALLEL.


def _focal_bce_kernel(logits_ref, label_ref, out_ref, acc_ref, *,
                      rows, block_rows, steps):
    p = pl.program_id(0)
    i = pl.program_id(1)

    @pl.when(i == 0)
    def _():
        acc_ref[...] = jnp.zeros_like(acc_ref)

    x = logits_ref[...].astype(jnp.float32)
    y = label_ref[...]
    is_pos = y == 1

    # z = -x for positives, +x for negatives. Then (identical math, fewer ops):
    #   ce   = max(x,0) - x*y + log1p(exp(-|x|)) == max(z,0) + log1p(e)
    #   1-pt = sigmoid(z) = (z>=0 ? inv : e*inv),  e = exp(-|x|), inv = 1/(1+e)
    z = jnp.where(is_pos, -x, x)
    e = jnp.exp(-jnp.abs(x))               # shared between BCE log term & sigmoid
    ce = jnp.maximum(z, 0.0) + jnp.log1p(e)
    inv = 1.0 / (1.0 + e)
    q = jnp.where(z >= 0.0, inv, e * inv)  # q == 1 - pt
    alpha_t = jnp.where(is_pos, ALPHA, 1.0 - ALPHA)
    loss = alpha_t * (q * q) * ce          # gamma == 2 -> plain square on the VPU

    def _accumulate(vals):
        if block_rows % ACC_SUBLANES == 0:
            acc_ref[...] += vals.reshape(-1, ACC_SUBLANES, LANES).sum(axis=0)
        else:
            # Tiny-input fallback (block_rows == rows, not sublane-aligned).
            acc_ref[0:1, :] += vals.sum(axis=0, keepdims=True)

    blk = p * steps + i
    start_row = blk * block_rows
    overruns = start_row + block_rows > rows   # only the ragged / OOB blocks

    @pl.when(jnp.logical_not(overruns))
    def _():
        _accumulate(loss)

    @pl.when(overruns)
    def _():
        # Row-granular select mask (NOT multiplicative) so unspecified /
        # duplicated rows — even NaN/Inf garbage — cannot leak into the sum.
        row_ids = start_row + jax.lax.broadcasted_iota(
            jnp.int32, (block_rows, LANES), 0)
        _accumulate(jnp.where(row_ids < rows, loss, 0.0))

    @pl.when(i == steps - 1)
    def _():
        out_ref[...] = acc_ref[...]


def focal_loss_bce(logits, label):
    """Pallas TPU FocalLoss_BCE (alpha=0.25, gamma=2, reduction='mean')."""
    assert logits.shape == label.shape
    n_elems = logits.size

    # Keep narrow float logits narrow (cast to f32 inside the kernel).
    if logits.dtype not in (jnp.float32, jnp.bfloat16, jnp.float16):
        logits = logits.astype(jnp.float32)
    # NOTE: labels are passed in their NATIVE dtype (no wrapper cast pass).
    # Hard {0,1} labels are assumed (the PyTorch module takes long labels).

    flat_logits = logits.reshape(-1)
    flat_label = label.reshape(-1)

    # Tiny lane-remainder pad only (never a full row-block pad). Pad values
    # (logit=+40, label=1) give a focal loss of exactly 0.0 in f32, so the
    # padded elements need no masking. When n_elems % 128 == 0 this is a
    # reshape-only (copy-free) path.
    lane_rem = n_elems % LANES
    if lane_rem:
        lane_pad = LANES - lane_rem
        flat_logits = jnp.pad(flat_logits, (0, lane_pad), constant_values=PAD_LOGIT)
        flat_label = jnp.pad(flat_label, (0, lane_pad), constant_values=1)

    rows = flat_logits.size // LANES
    logits_2d = flat_logits.reshape(rows, LANES)
    label_2d = flat_label.reshape(rows, LANES)

    num_cores = _num_tensorcores()
    rows_per_core = pl.cdiv(rows, num_cores)
    block_rows = min(TARGET_BLOCK_ROWS, _round_up(rows_per_core, ACC_SUBLANES))
    if block_rows > rows:
        block_rows = rows          # full-extent block for tiny inputs
    steps = pl.cdiv(rows_per_core, block_rows)
    last_block = max(pl.cdiv(rows, block_rows) - 1, 0)

    def in_map(p, i):
        # Clamp so blocks that land entirely past the ragged row count still
        # DMA an in-bounds block; their contribution is zeroed by the gated
        # in-kernel row mask.
        return (jnp.minimum(p * steps + i, last_block), 0)

    kernel = functools.partial(
        _focal_bce_kernel, rows=rows, block_rows=block_rows, steps=steps
    )

    bytes_accessed = (logits_2d.size * logits_2d.dtype.itemsize
                      + label_2d.size * label_2d.dtype.itemsize
                      + num_cores * ACC_SUBLANES * LANES * 4)
    cost = pl.CostEstimate(flops=15 * n_elems,
                           transcendentals=2 * n_elems,
                           bytes_accessed=bytes_accessed)

    partials = pl.pallas_call(
        kernel,
        out_shape=jax.ShapeDtypeStruct((num_cores * ACC_SUBLANES, LANES), jnp.float32),
        grid_spec=pltpu.PrefetchScalarGridSpec(
            num_scalar_prefetch=0,
            grid=(num_cores, steps),
            in_specs=[
                pl.BlockSpec((block_rows, LANES), in_map),
                pl.BlockSpec((block_rows, LANES), in_map),
            ],
            out_specs=pl.BlockSpec((ACC_SUBLANES, LANES), lambda p, i: (p, 0)),
            scratch_shapes=[pltpu.VMEM((ACC_SUBLANES, LANES), jnp.float32)],
        ),
        compiler_params=pltpu.CompilerParams(
            dimension_semantics=("parallel", "arbitrary"),
            vmem_limit_bytes=VMEM_LIMIT_BYTES,
        ),
        cost_estimate=cost,
    )(logits_2d, label_2d)

    # Single cross-lane reduce + mean, done once outside the kernel.
    # TODO(synk): for multi-billion-element inputs consider pairwise/block-wise
    # reduction for the running f32 sums.
    return partials.sum() * (1.0 / n_elems)


def focal_loss_bce_ref(logits, label):
    """Pure-JAX reference mirroring the PyTorch module."""
    x = logits.astype(jnp.float32)
    y = label
    yf = y.astype(jnp.float32)
    alpha_t = jnp.where(y == 1, ALPHA, 1.0 - ALPHA)
    probs = jax.nn.sigmoid(x)
    pt = jnp.where(y == 1, probs, 1.0 - probs)
    ce = jnp.maximum(x, 0.0) - x * yf + jnp.log1p(jnp.exp(-jnp.abs(x)))
    loss = alpha_t * jnp.power(1.0 - pt, GAMMA) * ce
    return loss.mean()


if __name__ == "__main__":
    key = jax.random.PRNGKey(0)
    k1, k2 = jax.random.split(key)

    # Small NCHW shape: (N=2, C=4, H=16, W=16) -> 2048 elements
    shape = (2, 4, 16, 16)
    logits = jax.random.normal(k1, shape, dtype=jnp.float32) * 2.0
    # "long"-style hard labels, passed in native int dtype (no wrapper cast).
    label = jax.random.bernoulli(k2, p=0.3, shape=shape).astype(jnp.int32)

    out = focal_loss_bce(logits, label)
    out = jax.block_until_ready(out)

    ref = focal_loss_bce_ref(logits, label)
    assert jnp.allclose(out, ref, rtol=1e-4, atol=1e-6), (out, ref)

    print("KERNEL_OK")
</pallas_src>

<mosaic_0001>
module attributes {stable_mosaic.version = 11 : i64} {
  func.func @_focal_bce_kernel(%arg0: i32, %arg1: i32, %arg2: memref<16x128xf32, #tpu.memory_space<vmem>>, %arg3: memref<16x128xi32, #tpu.memory_space<vmem>>, %arg4: memref<8x128xf32, #tpu.memory_space<vmem>>, %arg5: memref<8x128xf32, #tpu.memory_space<vmem>>) attributes {dimension_semantics = [#tpu.dimension_semantics<parallel>, #tpu.dimension_semantics<arbitrary>], iteration_bounds = array<i64: 1, 1>, scalar_prefetch = 0 : i64, scratch_operands = 1 : i64, tpu.core_type = #tpu.core_type<tc>, window_params = [{transform_indices = @transform_0, window_bounds = array<i64: 16, 128>}, {transform_indices = @transform_1, window_bounds = array<i64: 16, 128>}, {transform_indices = @transform_2, window_bounds = array<i64: 8, 128>}]} {
    %c0_i32 = arith.constant 0 : i32
    %0 = arith.cmpi eq, %arg1, %c0_i32 : i32
    %1 = arith.extui %0 : i1 to i32
    %c0_i32_0 = arith.constant 0 : i32
    %2 = arith.cmpi ne, %1, %c0_i32_0 : i32
    scf.if %2 {
      %cst_18 = arith.constant 0.000000e+00 : f32
      %45 = vector.broadcast %cst_18 : f32 to vector<8x128xf32>
      %c0_19 = arith.constant 0 : index
      %c0_20 = arith.constant 0 : index
      %46 = vector.load %arg5[%c0_19, %c0_20] : memref<8x128xf32, #tpu.memory_space<vmem>>, vector<8x128xf32>
      tpu.vector_store %arg5[%c0_19, %c0_20], %45 {strides = array<i32>} : memref<8x128xf32, #tpu.memory_space<vmem>>, vector<8x128xf32>,
    } else {
    }
    %c0 = arith.constant 0 : index
    %c0_1 = arith.constant 0 : index
    %3 = vector.load %arg2[%c0, %c0_1] : memref<16x128xf32, #tpu.memory_space<vmem>>, vector<16x128xf32>
    %c0_2 = arith.constant 0 : index
    %c0_3 = arith.constant 0 : index
    %4 = vector.load %arg3[%c0_2, %c0_3] : memref<16x128xi32, #tpu.memory_space<vmem>>, vector<16x128xi32>
    %c1_i32 = arith.constant 1 : i32
    %5 = vector.broadcast %c1_i32 : i32 to vector<16x128xi32>
    %6 = arith.cmpi eq, %4, %5 : vector<16x128xi32>
    %cst = arith.constant 0.000000e+00 : f32
    %7 = vector.broadcast %cst : f32 to vector<16x128xf32>
    %8 = arith.subf %7, %3 : vector<16x128xf32>
    %9 = arith.select %6, %8, %3 : vector<16x128xi1>, vector<16x128xf32>
    %10 = math.absf %3 : vector<16x128xf32>
    %cst_4 = arith.constant 0.000000e+00 : f32
    %11 = vector.broadcast %cst_4 : f32 to vector<16x128xf32>
    %12 = arith.subf %11, %10 : vector<16x128xf32>
    %13 = math.exp %12 : vector<16x128xf32>
    %cst_5 = arith.constant 0.000000e+00 : f32
    %14 = vector.broadcast %cst_5 : f32 to vector<16x128xf32>
    %15 = arith.maximumf %9, %14 : vector<16x128xf32>
    %16 = math.log1p %13 : vector<16x128xf32>
    %17 = arith.addf %15, %16 : vector<16x128xf32>
    %cst_6 = arith.constant 1.000000e+00 : f32
    %18 = vector.broadcast %cst_6 : f32 to vector<16x128xf32>
    %19 = arith.addf %18, %13 : vector<16x128xf32>
    %cst_7 = arith.constant 1.000000e+00 : f32
    %20 = vector.broadcast %cst_7 : f32 to vector<16x128xf32>
    %21 = arith.divf %20, %19 : vector<16x128xf32>
    %cst_8 = arith.constant 0.000000e+00 : f32
    %22 = vector.broadcast %cst_8 : f32 to vector<16x128xf32>
    %23 = arith.cmpf oge, %9, %22 : vector<16x128xf32>
    %24 = arith.mulf %13, %21 : vector<16x128xf32>
    %25 = arith.select %23, %21, %24 : vector<16x128xi1>, vector<16x128xf32>
    %cst_9 = arith.constant 2.500000e-01 : f32
    %cst_10 = arith.constant 7.500000e-01 : f32
    %26 = vector.broadcast %cst_9 : f32 to vector<16x128xf32>
    %27 = vector.broadcast %cst_10 : f32 to vector<16x128xf32>
    %28 = arith.select %6, %26, %27 : vector<16x128xi1>, vector<16x128xf32>
    %29 = arith.mulf %25, %25 : vector<16x128xf32>
    %30 = arith.mulf %28, %29 : vector<16x128xf32>
    %31 = arith.mulf %30, %17 : vector<16x128xf32>
    %c1_i32_11 = arith.constant 1 : i32
    %32 = arith.muli %arg0, %c1_i32_11 : i32
    %33 = arith.addi %32, %arg1 : i32
    %c16_i32 = arith.constant 16 : i32
    %34 = arith.muli %33, %c16_i32 : i32
    %c16_i32_12 = arith.constant 16 : i32
    %35 = arith.addi %34, %c16_i32_12 : i32
    %c16_i32_13 = arith.constant 16 : i32
    %36 = arith.cmpi sgt, %35, %c16_i32_13 : i32
    %true = arith.constant true
    %37 = arith.xori %36, %true : i1
    %38 = arith.extui %37 : i1 to i32
    %c0_i32_14 = arith.constant 0 : i32
    %39 = arith.cmpi ne, %38, %c0_i32_14 : i32
    scf.if %39 {
      %c0_18 = arith.constant 0 : index
      %c0_19 = arith.constant 0 : index
      %45 = vector.load %arg5[%c0_18, %c0_19] : memref<8x128xf32, #tpu.memory_space<vmem>>, vector<8x128xf32>
      %46 = vector.shape_cast %31 : vector<16x128xf32> to vector<2x8x128xf32>
      %cst_20 = arith.constant dense<0.000000e+00> : vector<8x128xf32>
      %47 = vector.multi_reduction <add>, %46, %cst_20 [0] : vector<2x8x128xf32> to vector<8x128xf32>
      %48 = arith.addf %45, %47 : vector<8x128xf32>
      %c0_21 = arith.constant 0 : index
      %c0_22 = arith.constant 0 : index
      %49 = vector.load %arg5[%c0_21, %c0_22] : memref<8x128xf32, #tpu.memory_space<vmem>>, vector<8x128xf32>
      tpu.vector_store %arg5[%c0_21, %c0_22], %48 {strides = array<i32>} : memref<8x128xf32, #tpu.memory_space<vmem>>, vector<8x128xf32>,
    } else {
    }
    %40 = arith.extui %36 : i1 to i32
    %c0_i32_15 = arith.constant 0 : i32
    %41 = arith.cmpi ne, %40, %c0_i32_15 : i32
    scf.if %41 {
      %45 = tpu.iota {dimensions = array<i32: 0>} : vector<16x128xi32>
      %46 = vector.broadcast %34 : i32 to vector<16x128xi32>
      %47 = arith.addi %46, %45 : vector<16x128xi32>
      %c16_i32_18 = arith.constant 16 : i32
      %48 = vector.broadcast %c16_i32_18 : i32 to vector<16x128xi32>
      %49 = arith.cmpi slt, %47, %48 : vector<16x128xi32>
      %cst_19 = arith.constant 0.000000e+00 : f32
      %50 = vector.broadcast %cst_19 : f32 to vector<16x128xf32>
      %51 = arith.select %49, %31, %50 : vector<16x128xi1>, vector<16x128xf32>
      %c0_20 = arith.constant 0 : index
      %c0_21 = arith.constant 0 : index
      %52 = vector.load %arg5[%c0_20, %c0_21] : memref<8x128xf32, #tpu.memory_space<vmem>>, vector<8x128xf32>
      %53 = vector.shape_cast %51 : vector<16x128xf32> to vector<2x8x128xf32>
      %cst_22 = arith.constant dense<0.000000e+00> : vector<8x128xf32>
      %54 = vector.multi_reduction <add>, %53, %cst_22 [0] : vector<2x8x128xf32> to vector<8x128xf32>
      %55 = arith.addf %52, %54 : vector<8x128xf32>
      %c0_23 = arith.constant 0 : index
      %c0_24 = arith.constant 0 : index
      %56 = vector.load %arg5[%c0_23, %c0_24] : memref<8x128xf32, #tpu.memory_space<vmem>>, vector<8x128xf32>
      tpu.vector_store %arg5[%c0_23, %c0_24], %55 {strides = array<i32>} : memref<8x128xf32, #tpu.memory_space<vmem>>, vector<8x128xf32>,
    } else {
    }
    %c0_i32_16 = arith.constant 0 : i32
    %42 = arith.cmpi eq, %arg1, %c0_i32_16 : i32
    %43 = arith.extui %42 : i1 to i32
    %c0_i32_17 = arith.constant 0 : i32
    %44 = arith.cmpi ne, %43, %c0_i32_17 : i32
    scf.if %44 {
      %c0_18 = arith.constant 0 : index
      %c0_19 = arith.constant 0 : index
      %45 = vector.load %arg5[%c0_18, %c0_19] : memref<8x128xf32, #tpu.memory_space<vmem>>, vector<8x128xf32>
      %c0_20 = arith.constant 0 : index
      %c0_21 = arith.constant 0 : index
      %46 = vector.load %arg4[%c0_20, %c0_21] : memref<8x128xf32, #tpu.memory_space<vmem>>, vector<8x128xf32>
      tpu.vector_store %arg4[%c0_20, %c0_21], %45 {strides = array<i32>} : memref<8x128xf32, #tpu.memory_space<vmem>>, vector<8x128xf32>,
    } else {
    }
    return
  }
  func.func @transform_0(%arg0: i32, %arg1: i32) -> (i32, i32) {
    %c1_i32 = arith.constant 1 : i32
    %0 = arith.muli %arg0, %c1_i32 : i32
    %1 = arith.addi %0, %arg1 : i32
    %c0_i32 = arith.constant 0 : i32
    %2 = arith.minsi %1, %c0_i32 : i32
    %c0_i32_0 = arith.constant 0 : i32
    %c0_i32_1 = arith.constant 0 : i32
    return %2, %c0_i32_0 : i32, i32
  }
  func.func @transform_1(%arg0: i32, %arg1: i32) -> (i32, i32) {
    %c1_i32 = arith.constant 1 : i32
    %0 = arith.muli %arg0, %c1_i32 : i32
    %1 = arith.addi %0, %arg1 : i32
    %c0_i32 = arith.constant 0 : i32
    %2 = arith.minsi %1, %c0_i32 : i32
    %c0_i32_0 = arith.constant 0 : i32
    %c0_i32_1 = arith.constant 0 : i32
    return %2, %c0_i32_0 : i32, i32
  }
  func.func @transform_2(%arg0: i32, %arg1: i32) -> (i32, i32) {
    %c0_i32 = arith.constant 0 : i32
    %c0_i32_0 = arith.constant 0 : i32
    return %arg0, %c0_i32 : i32, i32
  }
}

</mosaic_0001>

<bundles_post_ra>
// kernel: tpu_custom_call.1
= control target key start
LH: loop header
LB: loop body
LE: loop exit
PB: predicated region body
PF: predicated region fallthrough
CT: control target
= control target key end

     0   :  { %7 = vsyncpa [#allocation4], 0  ;;  %s342_s0 = inlined_call_operand.hbm [shape: f32[16,128], index: 0, kind: input, shape index: {}]   ;;  %s343_s1 = inlined_call_operand.hbm [shape: s32[16,128], index: 1, kind: input, shape index: {}]   ;;  %s344_s2 = inlined_call_operand.hbm [shape: f32[8,128], index: 2, kind: output, shape index: {}]  }
   0x1   :  { %8 = vsyncpa [#allocation7], 0 }
   0x2   :  { %9 = vsyncpa [#allocation5], 0  ;;  %s269_s9 = smov [#allocation3]   ;;  %s197_s13 = scalar_lea.hbm %s342_s0, 256 }
   0x3   :  { %s21_s10 = sshll.u32 %s269_s9, 4  ;;  %p198_p0 = scmp.ne.s32.totalorder %s342_s0, %s197_s13  ;;  %s22_s10 = int_to_ptr.vmem [resolvable:$true] %s21_s10 }
   0x4   :  { %p201_p1 = scmp.lt.u32.totalorder %s197_s13, %s342_s0 }
   0x6   :  { %p203_p2 = pnand %p201_p1, %p198_p0 }
   0x8   :  { %206 = shalt.err (!%p203_p2)
}
   0x9   :  { %s207_s18 = scalar_lea.vmem %s22_s10, 256  ;;  %p212_p4 = scmp.lt.s32.totalorder %s22_s10, %s22_s10 }
   0xa   :  { %p208_p3 = scmp.ne.s32.totalorder %s22_s10, %s207_s18  ;;  %p213_p5 = scmp.lt.s32.totalorder %s207_s18, %s207_s18 }
   0xc   :  { %p214_p6 = por %p213_p5, %p212_p4 }
   0xe   :  { %p215_p7 = pnand %p214_p6, %p208_p3 }
  0x10   :  { %218 = shalt.err (!%p215_p7)
}
  0x11   :  { %s270_s19 = smov 128   ;;  %s271_s20 = smov 8  }
  0x12   :  { %27 = dma.hbm_to_vmem [thread:$0]  %s342_s0, 256, %s22_s10, [#allocation4], %s270_s19, %s270_s19, %s271_s20  }
  0x13   :  { %s272_s23 = smov [#allocation6]   ;;  %s219_s27 = scalar_lea.hbm %s343_s1, 256 }
  0x14   :  { %s39_s24 = sshll.u32 %s272_s23, 4  ;;  %p220_p8 = scmp.ne.s32.totalorder %s343_s1, %s219_s27  ;;  %s40_s24 = int_to_ptr.vmem [resolvable:$true] %s39_s24 }
  0x15   :  { %p223_p9 = scmp.lt.u32.totalorder %s219_s27, %s343_s1 }
  0x17   :  { %p225_p10 = pnand %p223_p9, %p220_p8 }
  0x19   :  { %228 = shalt.err (!%p225_p10)
}
  0x1a   :  { %s229_s4 = scalar_lea.vmem %s40_s24, 256  ;;  %p234_p12 = scmp.lt.s32.totalorder %s40_s24, %s40_s24 }
  0x1b   :  { %p230_p11 = scmp.ne.s32.totalorder %s40_s24, %s229_s4  ;;  %p235_p13 = scmp.lt.s32.totalorder %s229_s4, %s229_s4 }
  0x1d   :  { %p236_p0 = por %p235_p13, %p234_p12 }
  0x1f   :  { %p237_p1 = pnand %p236_p0, %p230_p11 }
  0x21   :  { %240 = shalt.err (!%p237_p1)
}
  0x22   :  { %45 = dma.hbm_to_vmem [thread:$0]  %s343_s1, 256, %s40_s24, [#allocation7], %s270_s19, %s270_s19, %s271_s20  }
  0x23   :  { %263 = dma.done.wait [#allocation4], 256  }
  0x24   :  { %264 = vsyncadd [#allocation4], 4294967040 }
  0x25   :  { %265 = dma.done.wait [#allocation7], 256  }
  0x26   :  { %266 = vsyncadd [#allocation7], 4294967040  ;;  %v65_v0 = vld [vmem:[#allocation3] sm:$0xff]  ;;  %v66_v1 = vld [vmem:[#allocation3 + $0x8] sm:$0xff]  ;;  %v273_v41 = vmov 0.75   ;;  %s274_s1 = smov [#allocation8]  }
  0x27   :  { %v75_v2 = vand.u32 2147483647, %v65_v0  ;;  %v76_v3 = vand.u32 2147483647, %v66_v1  ;;  %v67_v14 = vld [vmem:[#allocation6] sm:$0xff]  ;;  %v68_v15 = vld [vmem:[#allocation6 + $0x8] sm:$0xff] }
  0x28   :  { %v71_v16 = vsub.f32 0.0, %v65_v0  ;;  %vm69_vm0 = vcmp.eq.s32.totalorder %v67_v14, 1  ;;  %v72_v18 = vsub.f32 0.0, %v66_v1  ;;  %vm70_vm1 = vcmp.eq.s32.totalorder %v68_v15, 1  ;;  %s165_s6 = sshll.u32 %s274_s1, 4  ;;  %s166_s6 = int_to_ptr.vmem [resolvable:$true] %s165_s6 }
  0x29   :  { %v77_v4 = vsub.f32 0.0, %v75_v2  ;;  %v78_v5 = vsub.f32 0.0, %v76_v3  ;;  %v117_v42 = vsel %vm69_vm0, 0.25, %v273_v41  ;;  %v118_v45 = vsel %vm70_vm1, 0.25, %v273_v41  ;;  %s241_s7 = scalar_lea.vmem %s166_s6, 128  ;;  %p246_p3 = scmp.lt.s32.totalorder %s166_s6, %s166_s6 }
  0x2a   :  { %v73_v22 = vsel %vm69_vm0, %v71_v16, %v65_v0  ;;  %v74_v25 = vsel %vm70_vm1, %v72_v18, %v66_v1  ;;  %p242_p2 = scmp.ne.s32.totalorder %s166_s6, %s241_s7  ;;  %p247_p4 = scmp.lt.s32.totalorder %s241_s7, %s241_s7 }
  0x2b   :  { %v79_v6 = vmul.f32 1.442695, %v77_v4  ;;  %v81_v7 = vmul.f32 1.442695, %v78_v5  ;;  %v83_v32 = vmax.f32 %v73_v22, 0.0  ;;  %vm111_vm4 = vcmp.ge.f32.partialorder %v73_v22, 0.0 }
  0x2c   :  { %v84_v35 = vmax.f32 %v74_v25, 0.0  ;;  %vm112_vm5 = vcmp.ge.f32.partialorder %v74_v25, 0.0  ;;  %p248_p5 = por %p247_p4, %p246_p3 }
  0x2d   :  { %185 = vpow2.f32 %v79_v6 }
  0x2e   :  { %187 = vpow2.f32 %v81_v7  ;;  %p249_p6 = pnand %p248_p5, %p242_p2 }
  0x37   :  { %v186_v8 = vpop.eup %185 }
  0x38   :  { %v188_v9 = vpop.eup %187  ;;  %v85_v10 = vadd.f32 1.0, %v186_v8  ;;  %v88_v12 = vmul.f32 -0.5, %v186_v8  ;;  %v91_v19 = vand.u32 2147483647, %v186_v8 }
  0x39   :  { %v94_v11 = vadd.f32 1.0, %v188_v9  ;;  %v97_v13 = vmul.f32 -0.5, %v188_v9  ;;  %v100_v21 = vand.u32 2147483647, %v188_v9 }
  0x3a   :  { %189 = vlog2.f32 %v85_v10  ;;  %v89_v17 = vadd.f32 1.0, %v88_v12  ;;  %vm316_vm2 = vcmp.lt.f32.partialorder %v91_v19, 0.0004427343 }
  0x3b   :  { %191 = vlog2.f32 %v94_v11  ;;  %v98_v20 = vadd.f32 1.0, %v97_v13  ;;  %vm320_vm3 = vcmp.lt.f32.partialorder %v100_v21, 0.0004427343 }
  0x3c   :  { %193 = vrcp.f32 %v85_v10  ;;  %v90_v23 = vmul.f32 %v186_v8, %v89_v17 }
  0x3d   :  { %195 = vrcp.f32 %v94_v11  ;;  %v99_v27 = vmul.f32 %v188_v9, %v98_v20 }
  0x44   :  { %v190_v24 = vpop.eup %189 }
  0x45   :  { %v192_v28 = vpop.eup %191  ;;  %v87_v29 = vmul.f32 0.6931472, %v190_v24 }
  0x46   :  { %v194_v31 = vpop.eup %193  ;;  %v96_v33 = vmul.f32 0.6931472, %v192_v28 }
  0x47   :  { %v196_v34 = vpop.eup %195  ;;  %v93_v36 = vsel %vm316_vm2, %v90_v23, %v87_v29  ;;  %v113_v37 = vmul.f32 %v194_v31, %v186_v8 }
  0x48   :  { %v102_v38 = vsel %vm320_vm3, %v99_v27, %v96_v33  ;;  %v114_v39 = vmul.f32 %v196_v34, %v188_v9  ;;  %v103_v43 = vadd.f32 %v93_v36, %v83_v32 }
  0x49   :  { %v115_v40 = vsel %vm111_vm4, %v194_v31, %v113_v37  ;;  %v104_v47 = vadd.f32 %v102_v38, %v84_v35 }
  0x4a   :  { %v116_v44 = vsel %vm112_vm5, %v196_v34, %v114_v39  ;;  %v119_v46 = vmul.f32 %v115_v40, %v115_v40 }
  0x4b   :  { %v120_v48 = vmul.f32 %v116_v44, %v116_v44 }
  0x4c   :  { %v121_v49 = vmul.f32 %v119_v46, %v117_v42 }
  0x4d   :  { %v122_v50 = vmul.f32 %v120_v48, %v118_v45 }
  0x4e   :  { %v123_v51 = vmul.f32 %v121_v49, %v103_v43 }
  0x4f   :  { %v124_v52 = vmul.f32 %v122_v50, %v104_v47 }
  0x51   :  { %v134_v53 = vadd.f32 %v124_v52, %v123_v51 }
  0x53   :  { %158 = vst [vmem:[#allocation8] sm:$0xff] %v134_v53 }
  0x54   :  { %252 = shalt.err (!%p249_p6)
}
  0x55   :  { %s253_s10 = scalar_lea.hbm %s344_s2, 128 }
  0x56   :  { %p254_p7 = scmp.ne.s32.totalorder %s344_s2, %s253_s10  ;;  %p257_p8 = scmp.lt.u32.totalorder %s253_s10, %s344_s2 }
  0x58   :  { %p259_p9 = pnand %p257_p8, %p254_p7 }
  0x5a   :  { %262 = shalt.err (!%p259_p9)
}
  0x5b   :  { %168 = dma.vmem_to_hbm [thread:$0]  %s166_s6, 128, %s344_s2, [#allocation5]  }
  0x5c   :  { %267 = dma.done.wait [#allocation5], 128  }
  0x5d   :  { %268 = vsyncadd [#allocation5], 4294967168 }
  0x5e   :  { %172 = vsyncpa [#allocation4], 1 }
  0x5f   :  { %173 = vsyncpa [#allocation7], 1 }
  0x60   :  { %174 = vsyncpa [#allocation5], 1 }

</bundles_post_ra>
